<compile_context>
chip_gen: v7x
topology: tpu7x:2x2x1
jax: 0.10.0
libtpu: 0.0.40
codegen_flags: <defaults>
</compile_context>

<pallas_src>
import functools

import jax
import jax.numpy as jnp
from jax import lax
from jax.experimental import pallas as pl
from jax.experimental.pallas import tpu as pltpu


def _round_up(x, m):
    return ((x + m - 1) // m) * m


_ONEHOT_MAX_NV_IN = 8192  # VPU one-hot build cost caps usable coarse-table rows


def _unpool3d_onehot_kernel(idx_ref, x_ref, o_ref):
    """Fill one lane-dense (tile, C) output tile with a vectorized gather.

    idx_ref : (tile, 1) int32  VMEM   fine->coarse vertex map slice for this tile
    x_ref   : (nv_in, C)       VMEM   full coarse-mesh feature table (resident)
    o_ref   : (tile, C)        VMEM   output tile
    """
    nv_in = x_ref.shape[0]
    tile = idx_ref.shape[0]

    # Clamp defensively (matches XLA-gather / reference semantics for any
    # out-of-range sentinel in vt_map).
    idx = jnp.clip(idx_ref[...], 0, nv_in - 1)                 # (tile, 1)
    iota = lax.broadcasted_iota(jnp.int32, (tile, nv_in), 1)   # (tile, nv_in)
    hit = idx == iota                                          # one True per row

    if x_ref.dtype == jnp.bfloat16:
        # bf16 is a native MXU operand dtype: one-hot @ table with f32
        # accumulation is bit-exact (exactly one non-zero term per row).
        onehot = hit.astype(jnp.bfloat16)
        out = jnp.dot(onehot, x_ref[...], preferred_element_type=jnp.float32)
        o_ref[...] = out.astype(o_ref.dtype)
    else:
        # float32: gather each byte of the f32 bit pattern separately so the
        # result is bit-exact no matter how the MXU decomposes f32 matmuls.
        # NOTE: for very large nv_in*C the per-tile byte extraction becomes
        # VPU-bound; hoist plane extraction to the wrapper in that regime.
        onehot = hit.astype(jnp.float32)
        x_bits = pltpu.bitcast(x_ref[...], jnp.int32)          # (nv_in, C)
        out_bits = None
        for b in range(4):
            plane = ((x_bits >> (8 * b)) & 0xFF).astype(jnp.float32)
            g = jnp.dot(onehot, plane, preferred_element_type=jnp.float32)
            g_bits = g.astype(jnp.int32) << (8 * b)
            out_bits = g_bits if out_bits is None else out_bits | g_bits
        o_ref[...] = pltpu.bitcast(out_bits, jnp.float32)


def _vmem_capacity_bytes():
    try:
        return int(pltpu.get_tpu_info().vmem_capacity_bytes)
    except Exception:  # conservative fallback: v7x per-TensorCore VMEM
        return 64 * 2**20


@functools.partial(jax.jit, static_argnames=("tile_n",))
def unpool3d(inputs, vt_replace, vt_map, *, tile_n=1024):
    """outputs[v] = inputs[vt_map[v]] for every output (fine-mesh) vertex v."""
    del vt_replace  # backward-only quantity; dead in the forward gather
    if inputs.dtype not in (jnp.float32, jnp.bfloat16):
        # TODO(synk): extend the byte-plane gather to other element widths.
        raise NotImplementedError(
            f"unpool3d kernel supports float32/bfloat16 features, got {inputs.dtype}")

    nv_in, C = inputs.shape
    nv_out = vt_map.shape[0]
    itemsize = jnp.dtype(inputs.dtype).itemsize

    # Output tiles: C stays whole on the lane axis (lane-dense stores; best when
    # C is a multiple of 128). Rows tiled large to amortize per-step overhead,
    # but bounded so the (tile, nv_in) one-hot intermediate stays ~<= 4 MiB.
    max_tile_for_onehot = max(8, (4 * 2**20) // (4 * max(nv_in, 1)))
    tile = max(8, _round_up(min(int(tile_n), nv_out, max_tile_for_onehot), 8))
    grid = (pl.cdiv(nv_out, tile),)
    nv_pad = grid[0] * tile

    # VMEM working set (blocked specs are double-buffered by Pallas).
    # TODO(synk): single-buffer the constant-index table (pl.Buffered(1)) to
    # halve its footprint on 64 MiB/TC parts once that API path is settled.
    table_bytes = nv_in * C * itemsize
    out_tile_bytes = tile * C * itemsize
    idx_tile_bytes = tile * 128 * 4            # (tile, 1) block pads to 128 lanes
    interm_bytes = tile * nv_in * 4 + 4 * tile * C * 4 + 2 * nv_in * C * 4
    working = 2 * table_bytes + 2 * out_tile_bytes + 2 * idx_tile_bytes + interm_bytes
    vmem_cap = int(0.7 * _vmem_capacity_bytes())   # generation-aware ceiling
    if nv_in > _ONEHOT_MAX_NV_IN or working + (2 << 20) > vmem_cap:
        # TODO(synk): stream the coarse table / gather rows with manual
        # make_async_copy DMAs once coarse meshes outgrow the resident design.
        raise NotImplementedError(
            "coarse table too large for the VMEM-resident one-hot gather "
            f"(nv_in={nv_in}, ~{working / 2**20:.1f} MiB working set, "
            f"cap {vmem_cap / 2**20:.1f} MiB)")
    vmem_limit = int(min(vmem_cap, max(16 * 2**20, working + (4 << 20))))

    # Indices as an (nv_pad, 1) column so the per-tile block is already
    # sublane-major for the row-wise compare (no in-kernel relayout). Only the
    # tiny index vector is padded; the output is written at its true size.
    vt_map_p = vt_map.astype(jnp.int32).reshape(nv_out, 1)
    if nv_pad != nv_out:
        vt_map_p = jnp.pad(vt_map_p, ((0, nv_pad - nv_out), (0, 0)))

    cost = pl.CostEstimate(
        flops=2 * nv_pad * nv_in * C,
        transcendentals=0,
        bytes_accessed=int(table_bytes + nv_pad * 4 + nv_out * C * itemsize),
    )

    return pl.pallas_call(
        _unpool3d_onehot_kernel,
        out_shape=jax.ShapeDtypeStruct((nv_out, C), inputs.dtype),
        grid=grid,
        in_specs=[
            # Per-tile slice of the fine->coarse vertex map (tiny VMEM block).
            pl.BlockSpec((tile, 1), lambda i: (i, 0)),
            # Whole coarse-mesh feature table; constant block index => fetched
            # into VMEM once and kept resident across the grid (single HBM pass).
            pl.BlockSpec((nv_in, C), lambda i: (0, 0)),
        ],
        out_specs=pl.BlockSpec((tile, C), lambda i: (i, 0)),
        compiler_params=pltpu.CompilerParams(
            dimension_semantics=("parallel",),
            vmem_limit_bytes=vmem_limit,
        ),
        cost_estimate=cost,
    )(vt_map_p, inputs)


def _reference(inputs, vt_map):
    """Pure-JAX reference mirroring unpool3d.interpolate's forward."""
    nv_in = inputs.shape[0]
    return inputs[jnp.clip(vt_map, 0, nv_in - 1)]


if __name__ == "__main__":
    key = jax.random.PRNGKey(0)
    k1, k2, k3, k4 = jax.random.split(key, 4)

    # Case 1: float32 features, grid divides evenly (coarse 64 -> fine 256, C=128).
    NV_IN, NV_OUT, C = 64, 256, 128
    x32 = jax.random.normal(k1, (NV_IN, C), dtype=jnp.float32)
    vt_map = jax.random.randint(k2, (NV_OUT,), 0, NV_IN, dtype=jnp.int32)
    vt_replace = jax.random.randint(k3, (NV_OUT,), 1, 5, dtype=jnp.int32)
    out = jax.block_until_ready(unpool3d(x32, vt_replace, vt_map, tile_n=128))
    assert out.shape == (NV_OUT, C)
    assert jnp.array_equal(out, _reference(x32, vt_map)), "f32 mismatch"

    # Case 2: float32, ragged last tile (nv_out not a multiple of the tile).
    NV_OUT2 = 300
    vt_map2 = jax.random.randint(k4, (NV_OUT2,), 0, NV_IN, dtype=jnp.int32)
    vt_rep2 = jnp.ones((NV_OUT2,), jnp.int32)
    out2 = jax.block_until_ready(unpool3d(x32, vt_rep2, vt_map2, tile_n=128))
    assert out2.shape == (NV_OUT2, C)
    assert jnp.array_equal(out2, _reference(x32, vt_map2)), "ragged mismatch"

    # Case 3: bfloat16 features (direct one-hot MXU path, default tile).
    x16 = x32.astype(jnp.bfloat16)
    out3 = jax.block_until_ready(unpool3d(x16, vt_replace, vt_map))
    assert jnp.array_equal(out3, _reference(x16, vt_map)), "bf16 mismatch"

    print("KERNEL_OK")
</pallas_src>

<mosaic_0001>
module attributes {stable_mosaic.version = 11 : i64} {
  func.func @_unpool3d_onehot_kernel(%arg0: i32, %arg1: memref<128x1xi32, #tpu.memory_space<vmem>>, %arg2: memref<64x128xf32, #tpu.memory_space<vmem>>, %arg3: memref<128x128xf32, #tpu.memory_space<vmem>>) attributes {dimension_semantics = [#tpu.dimension_semantics<parallel>], iteration_bounds = array<i64: 2>, scalar_prefetch = 0 : i64, scratch_operands = 0 : i64, tpu.core_type = #tpu.core_type<tc>, window_params = [{transform_indices = @transform_0, window_bounds = array<i64: 128, 1>}, {pipeline_mode = #tpu.pipeline_mode<synchronous>, transform_indices = @transform_1, window_bounds = array<i64: 64, 128>}, {transform_indices = @transform_2, window_bounds = array<i64: 128, 128>}]} {
    %c0 = arith.constant 0 : index
    %c0_0 = arith.constant 0 : index
    %0 = vector.load %arg1[%c0, %c0_0] : memref<128x1xi32, #tpu.memory_space<vmem>>, vector<128x1xi32>
    %c0_i32 = arith.constant 0 : i32
    %c63_i32 = arith.constant 63 : i32
    %1 = vector.broadcast %c0_i32 : i32 to vector<128x1xi32>
    %2 = arith.maxsi %1, %0 : vector<128x1xi32>
    %3 = vector.broadcast %c63_i32 : i32 to vector<128x1xi32>
    %4 = arith.minsi %3, %2 : vector<128x1xi32>
    %5 = tpu.iota {dimensions = array<i32: 1>} : vector<128x64xi32>
    %6 = vector.broadcast %4 : vector<128x1xi32> to vector<128x64xi32>
    %7 = arith.cmpi eq, %6, %5 : vector<128x64xi32>
    %8 = arith.extui %7 : vector<128x64xi1> to vector<128x64xi32>
    %9 = arith.sitofp %8 : vector<128x64xi32> to vector<128x64xf32>
    %c0_1 = arith.constant 0 : index
    %c0_2 = arith.constant 0 : index
    %10 = vector.load %arg2[%c0_1, %c0_2] : memref<64x128xf32, #tpu.memory_space<vmem>>, vector<64x128xf32>
    %11 = tpu.bitcast %10 : vector<64x128xf32> -> vector<64x128xi32>
    %c0_i32_3 = arith.constant 0 : i32
    %12 = vector.broadcast %c0_i32_3 : i32 to vector<64x128xi32>
    %13 = arith.shrsi %11, %12 : vector<64x128xi32>
    %c255_i32 = arith.constant 255 : i32
    %14 = vector.broadcast %c255_i32 : i32 to vector<64x128xi32>
    %15 = arith.andi %13, %14 : vector<64x128xi32>
    %16 = arith.sitofp %15 : vector<64x128xi32> to vector<64x128xf32>
    %cst = arith.constant dense<0.000000e+00> : vector<128x128xf32>
    %17 = tpu.matmul %9, %16, %cst {dimension_numbers = #tpu.dot_dimension_numbers<[1], [0], [0], [1], [0, 0, 1, 1], [], []>} : vector<128x64xf32>, vector<64x128xf32>, vector<128x128xf32> -> vector<128x128xf32>
    %18 = arith.fptosi %17 : vector<128x128xf32> to vector<128x128xi32>
    %c0_i32_4 = arith.constant 0 : i32
    %19 = vector.broadcast %c0_i32_4 : i32 to vector<128x128xi32>
    %20 = arith.shli %18, %19 : vector<128x128xi32>
    %c8_i32 = arith.constant 8 : i32
    %21 = vector.broadcast %c8_i32 : i32 to vector<64x128xi32>
    %22 = arith.shrsi %11, %21 : vector<64x128xi32>
    %c255_i32_5 = arith.constant 255 : i32
    %23 = vector.broadcast %c255_i32_5 : i32 to vector<64x128xi32>
    %24 = arith.andi %22, %23 : vector<64x128xi32>
    %25 = arith.sitofp %24 : vector<64x128xi32> to vector<64x128xf32>
    %cst_6 = arith.constant dense<0.000000e+00> : vector<128x128xf32>
    %26 = tpu.matmul %9, %25, %cst_6 {dimension_numbers = #tpu.dot_dimension_numbers<[1], [0], [0], [1], [0, 0, 1, 1], [], []>} : vector<128x64xf32>, vector<64x128xf32>, vector<128x128xf32> -> vector<128x128xf32>
    %27 = arith.fptosi %26 : vector<128x128xf32> to vector<128x128xi32>
    %c8_i32_7 = arith.constant 8 : i32
    %28 = vector.broadcast %c8_i32_7 : i32 to vector<128x128xi32>
    %29 = arith.shli %27, %28 : vector<128x128xi32>
    %30 = arith.ori %20, %29 : vector<128x128xi32>
    %c16_i32 = arith.constant 16 : i32
    %31 = vector.broadcast %c16_i32 : i32 to vector<64x128xi32>
    %32 = arith.shrsi %11, %31 : vector<64x128xi32>
    %c255_i32_8 = arith.constant 255 : i32
    %33 = vector.broadcast %c255_i32_8 : i32 to vector<64x128xi32>
    %34 = arith.andi %32, %33 : vector<64x128xi32>
    %35 = arith.sitofp %34 : vector<64x128xi32> to vector<64x128xf32>
    %cst_9 = arith.constant dense<0.000000e+00> : vector<128x128xf32>
    %36 = tpu.matmul %9, %35, %cst_9 {dimension_numbers = #tpu.dot_dimension_numbers<[1], [0], [0], [1], [0, 0, 1, 1], [], []>} : vector<128x64xf32>, vector<64x128xf32>, vector<128x128xf32> -> vector<128x128xf32>
    %37 = arith.fptosi %36 : vector<128x128xf32> to vector<128x128xi32>
    %c16_i32_10 = arith.constant 16 : i32
    %38 = vector.broadcast %c16_i32_10 : i32 to vector<128x128xi32>
    %39 = arith.shli %37, %38 : vector<128x128xi32>
    %40 = arith.ori %30, %39 : vector<128x128xi32>
    %c24_i32 = arith.constant 24 : i32
    %41 = vector.broadcast %c24_i32 : i32 to vector<64x128xi32>
    %42 = arith.shrsi %11, %41 : vector<64x128xi32>
    %c255_i32_11 = arith.constant 255 : i32
    %43 = vector.broadcast %c255_i32_11 : i32 to vector<64x128xi32>
    %44 = arith.andi %42, %43 : vector<64x128xi32>
    %45 = arith.sitofp %44 : vector<64x128xi32> to vector<64x128xf32>
    %cst_12 = arith.constant dense<0.000000e+00> : vector<128x128xf32>
    %46 = tpu.matmul %9, %45, %cst_12 {dimension_numbers = #tpu.dot_dimension_numbers<[1], [0], [0], [1], [0, 0, 1, 1], [], []>} : vector<128x64xf32>, vector<64x128xf32>, vector<128x128xf32> -> vector<128x128xf32>
    %47 = arith.fptosi %46 : vector<128x128xf32> to vector<128x128xi32>
    %c24_i32_13 = arith.constant 24 : i32
    %48 = vector.broadcast %c24_i32_13 : i32 to vector<128x128xi32>
    %49 = arith.shli %47, %48 : vector<128x128xi32>
    %50 = arith.ori %40, %49 : vector<128x128xi32>
    %51 = tpu.bitcast %50 : vector<128x128xi32> -> vector<128x128xf32>
    %c0_14 = arith.constant 0 : index
    %c0_15 = arith.constant 0 : index
    %52 = vector.load %arg3[%c0_14, %c0_15] : memref<128x128xf32, #tpu.memory_space<vmem>>, vector<128x128xf32>
    tpu.vector_store %arg3[%c0_14, %c0_15], %51 {strides = array<i32>} : memref<128x128xf32, #tpu.memory_space<vmem>>, vector<128x128xf32>,
    return
  }
  func.func @transform_0(%arg0: i32) -> (i32, i32) {
    %c0_i32 = arith.constant 0 : i32
    %c0_i32_0 = arith.constant 0 : i32
    return %arg0, %c0_i32 : i32, i32
  }
  func.func @transform_1(%arg0: i32) -> (i32, i32) {
    %c0_i32 = arith.constant 0 : i32
    %c0_i32_0 = arith.constant 0 : i32
    %c0_i32_1 = arith.constant 0 : i32
    return %c0_i32, %c0_i32_0 : i32, i32
  }
  func.func @transform_2(%arg0: i32) -> (i32, i32) {
    %c0_i32 = arith.constant 0 : i32
    %c0_i32_0 = arith.constant 0 : i32
    return %arg0, %c0_i32 : i32, i32
  }
}

</mosaic_0001>

<bundles_post_ra>
// kernel: unpool3d.1
= control target key start
LH: loop header
LB: loop body
LE: loop exit
PB: predicated region body
PF: predicated region fallthrough
CT: control target
= control target key end

     0   :  { %7 = vsyncpa [#allocation3], 0  ;;  %s2445_s0 = inlined_call_operand.vmem [shape: s32[256,1], index: 0, kind: input, shape index: {}]   ;;  %s2446_s1 = inlined_call_operand.vmem [shape: f32[64,128], index: 1, kind: input, shape index: {}]   ;;  %s2447_s2 = inlined_call_operand.hbm [shape: f32[256,128], index: 2, kind: output, shape index: {}]  }
   0x1   :  { %9 = vsyncpa [#allocation3 + $0x1], 0  ;;  %s2002_s9 = smov 0   ;;  %s2004_s10 = smov 0  }
   0x2   :  { %s2006_s11 = smov 0   ;;  %s2008_s12 = smov 0  }
   0x3 LB: > { %s2023_s13 = sadd.s32 4294967295, %s1980_s12   ;;  %s1324_s14 = sadd.s32 4294967294, %s1980_s12   ;;  %s1980_s12 = sphi %s2008_s12, %s2453_s12   ;;  %s1976_s11 = sphi %s2006_s11, %s2452_s11   ;;  %s1972_s10 = sphi %s2004_s10, %s2451_s10   ;;  %s1968_s9 = sphi %s2002_s9, %s2450_s9  }
   0x4   : > { %s2027_s15 = sadd.s32 1, %s1980_s12   ;;  %s69_s16 = sadd.s32 1, %s1976_s11 }
   0x5   : > { %s66_s17 = ssub.s32 %s1980_s12, %s2027_s15  ;;  %p79_p0 = scmp.ne.s32.totalorder %s1976_s11, %s1972_s10 }
   0x6   : > { %p67_p1 = scmp.eq.s32.totalorder %s66_s17, 0  ;;  %p80_p2 = scmp.eq.s32.totalorder %s2023_s13, 1 }
   0x7   : > { %p85_p3 = scmp.ne.s32.totalorder %s1972_s10, %s1968_s9  ;;  %p86_p4 = scmp.eq.s32.totalorder %s1324_s14, 1 }
   0x8   : > { %s2038_s18 = scalar_select %p67_p1, %s1976_s11, %s69_s16  }
   0x9   : > { %p2040_p5 = por %p80_p2, %p79_p0  ;;  %p2044_p6 = por %p86_p4, %p85_p3 }
   0xa   : > { %p1327_p7 = scmp.ge.s32.totalorder %s1980_s12, 1  ;;  %p116_p8 = scmp.lt.s32.totalorder %s1980_s12, 3 }
   0xc   : > { %p117_p9 = pnand %p1327_p7, %p116_p8 }
   0xd   : > { %s1329_s21 = sshll.u32 (!%p117_p9), %s2023_s13, 4  ;;  %v2054_v0 = vld [vmem:[%s2446_s1] sm:$0xff] (!%p117_p9)  ;;  %v2059_v1 = vld [vmem:[%s2446_s1 + $0x8] sm:$0xff] (!%p117_p9)  ;;  %v2064_v2 = vld [vmem:[%s2446_s1 + $0x10] sm:$0xff] (!%p117_p9)  ;;  %v1982_v3 = vmov (!%p117_p9), 0   ;;  %s135_s23 = sand.u32 (!%p117_p9), 1, %s1972_s10  }
   0xe   : > { %120 = sbr.rel (%p117_p9) target bundleno = 462 (0x1ce), region = 28  ;;  %1917 = vset.pattern.permute.xlu1 (!%p117_p9), %v1982_v3  ;;  %1916 = vset.pattern.permute.xlu0 (!%p117_p9), %v1982_v3  ;;  %p139_p10 = scmp.lt.s32.totalorder (!%p117_p9), %s1329_s21, 31  ;;  %v339_v4 = vand.u32 (!%p117_p9), 255, %v2054_v0  ;;  %v340_v5 = vand.u32 (!%p117_p9), 255, %v2059_v1  ;;  %v565_v6 = vshra.s32 (!%p117_p9), %v2054_v0, 8  ;;  %v566_v7 = vshra.s32 (!%p117_p9), %v2059_v1, 8 }
   0xf   : > { %v2073_v8 = vld [vmem:[%s2446_s1 + $0x18] sm:$0xff] (!%p117_p9)  ;;  %v341_v9 = vand.u32 (!%p117_p9), 255, %v2064_v2  ;;  %v567_v11 = vshra.s32 (!%p117_p9), %v2064_v2, 8  ;;  %v2087_v27 = vld [vmem:[%s2446_s1 + $0x20] sm:$0xff] (!%p117_p9)  ;;  %v2102_v48 = vld [vmem:[%s2446_s1 + $0x28] sm:$0xff] (!%p117_p9)  ;;  %s1328_s24 = sshll.u32 (!%p117_p9), %s135_s23, 7 }
  0x10   : > { %v342_v10 = vand.u32 (!%p117_p9), 255, %v2073_v8  ;;  %v568_v12 = vshra.s32 (!%p117_p9), %v2073_v8, 8  ;;  %v347_v13 = vcvt.s32.f32 (!%p117_p9), %v339_v4  ;;  %v348_v14 = vcvt.s32.f32 (!%p117_p9), %v340_v5  ;;  %s2361_s25 = scalar_lea.vmem (!%p117_p9), [#allocation2], %s1328_s24  ;;  %s1424_s26 = sshll.u32 (!%p117_p9), %s2023_s13, 11 }
  0x11   : > { %v573_v15 = vand.u32 (!%p117_p9), 255, %v565_v6  ;;  %v574_v16 = vand.u32 (!%p117_p9), 255, %v566_v7  ;;  %v349_v17 = vcvt.s32.f32 (!%p117_p9), %v341_v9  ;;  %v575_v19 = vand.u32 (!%p117_p9), 255, %v567_v11  ;;  %s1262_s27 = sshll.u32 (!%p117_p9), %s2361_s25, 4  ;;  %s2404_s13 = scalar_lea.sflag (!%p117_p9), [#allocation3], %s135_s23  ;;  %s2398_s27 = int_to_ptr.vmem [resolvable:$true] %s1262_s27 }
  0x12   : > { %v350_v18 = vcvt.s32.f32 (!%p117_p9), %v342_v10  ;;  %v576_v20 = vand.u32 (!%p117_p9), 255, %v568_v12  ;;  %v1681_v21 = vpack.c.bf16 (!%p117_p9), %v348_v14, %v347_v13  ;;  %v343_v32 = vand.u32 (!%p117_p9), 255, %v2087_v27  ;;  %s1918_s3 = scalar_lea.vmem (!%p117_p9), %s2398_s27, 2048  ;;  %s1984_s4 = smov (!%p117_p9), [#allocation2]  }
  0x13   : > { %v581_v22 = vcvt.s32.f32 (!%p117_p9), %v573_v15  ;;  %v582_v23 = vcvt.s32.f32 (!%p117_p9), %v574_v16  ;;  %v583_v25 = vcvt.s32.f32 (!%p117_p9), %v575_v19  ;;  %v344_v55 = vand.u32 (!%p117_p9), 255, %v2102_v48  ;;  %p1919_p11 = scmp.ne.s32.totalorder (!%p117_p9), %s2398_s27, %s1918_s3 }
  0x14   : > { %v1685_v24 = vpack.c.bf16 (!%p117_p9), %v350_v18, %v349_v17  ;;  %v584_v26 = vcvt.s32.f32 (!%p117_p9), %v576_v20  ;;  %1682 = vmatprep.subr.bf16.mxu0 (!%p117_p9), %v1681_v21  ;;  %v351_v58 = vcvt.s32.f32 (!%p117_p9), %v343_v32  ;;  %v569_v7 = vshra.s32 (!%p117_p9), %v2087_v27, 8  ;;  %v2125_v20 = vld [vmem:[%s2446_s1 + $0x30] sm:$0xff] (!%p117_p9) }
  0x15   : > { %s2455_s21 = smov (!%p139_p10, %s1329_s21), 31  ;;  %v1697_v31 = vpack.c.bf16 %v582_v23, %v581_v22  ;;  %1684 = vmatpush3.bf16.msra.mxu0 %v1681_v21  ;;  %v570_v9 = vshra.s32 %v2102_v48, 8  ;;  %v352_v22 = vcvt.s32.f32 %v344_v55  ;;  %p1920_p12 = pnand %p1919_p11, %p2040_p5 }
  0x16   : > { %s1330_s30 = sshll.u32 %s2455_s21, 3  ;;  %v1701_v35 = vpack.c.bf16 %v584_v26, %v583_v25  ;;  %1686 = vmatprep.subr.bf16.mxu0 %v1685_v24  ;;  %v577_v23 = vand.u32 255, %v569_v7  ;;  %v2130_v25 = vld [vmem:[%s2446_s1 + $0x38] sm:$0xff] }
  0x17   : > { %s2082_s5 = scalar_lea.vmem %s2445_s0, %s1330_s30  ;;  %1698 = vmatprep.subr.bf16.mxu1 %v1697_v31  ;;  %s2396_s30 = scalar_lea.hbm %s2447_s2, %s1424_s26 }
  0x18   : > { %v147_v28 = vld [vmem:[%s2082_s5 + $0x10] sm:$0xff]  ;;  %v145_v29 = vld [vmem:[%s2082_s5] sm:$0xff]  ;;  %v148_v30 = vld [vmem:[%s2082_s5 + $0x18] sm:$0xff]  ;;  %1700 = vmatpush3.bf16.msra.mxu1 %v1697_v31  ;;  %v585_v31 = vcvt.s32.f32 %v577_v23  ;;  %v1401_v23 = vshrl.u32 %v2125_v20, 24  ;;  %p1921_p13 = pneg %p1920_p12 }
  0x19   : > { %vm165_vm0 = vcmp.gt.s32.totalorder %v147_v28, 0  ;;  %vm161_vm1 = vcmp.gt.s32.totalorder %v145_v29, 0  ;;  %vm167_vm2 = vcmp.gt.s32.totalorder %v148_v30, 0  ;;  %v146_v33 = vld [vmem:[%s2082_s5 + $0x8] sm:$0xff]  ;;  %v149_v39 = vld [vmem:[%s2082_s5 + $0x20] sm:$0xff]  ;;  %v152_v40 = vld [vmem:[%s2082_s5 + $0x38] sm:$0xff]  ;;  %1702 = vmatprep.subr.bf16.mxu1 %v1701_v35  ;;  %1688 = vmatpush3.bf16.msra.mxu0 %v1685_v24 }
  0x1a   : > { %v150_v34 = vld [vmem:[%s2082_s5 + $0x28] sm:$0xff]  ;;  %v166_v36 = vsel %vm165_vm0, %v147_v28, 0  ;;  %v162_v37 = vsel %vm161_vm1, %v145_v29, 0  ;;  %v168_v38 = vsel %vm167_vm2, %v148_v30, 0  ;;  %vm163_vm3 = vcmp.gt.s32.totalorder %v146_v33, 0  ;;  %v151_v42 = vld [vmem:[%s2082_s5 + $0x30] sm:$0xff] }
  0x1b   : > { %vm197_vm4 = vcmp.lt.s32.totalorder %v166_v36, 63  ;;  %vm193_vm5 = vcmp.lt.s32.totalorder %v162_v37, 63  ;;  %vm199_vm6 = vcmp.lt.s32.totalorder %v168_v38, 63  ;;  %v164_v41 = vsel %vm163_vm3, %v146_v33, 0  ;;  %v154_v47 = vld [vmem:[%s2082_s5 + $0x48] sm:$0xff]  ;;  %v153_v52 = vld [vmem:[%s2082_s5 + $0x40] sm:$0xff] }
  0x1c   : > { %v198_v43 = vsel %vm197_vm4, %v166_v36, 63  ;;  %v194_v44 = vsel %vm193_vm5, %v162_v37, 63  ;;  %v200_v45 = vsel %vm199_vm6, %v168_v38, 63  ;;  %vm195_vm7 = vcmp.lt.s32.totalorder %v164_v41, 63  ;;  %v156_v53 = vld [vmem:[%s2082_s5 + $0x58] sm:$0xff]  ;;  %v155_v54 = vld [vmem:[%s2082_s5 + $0x50] sm:$0xff]  ;;  %1704 = vmatpush3.bf16.msra.mxu1 %v1701_v35 }
  0x1d   : > { %234 = vperm.xlu1 %1917, %v198_v43   ;;  %228 = vperm.xlu0 %1916, %v194_v44   ;;  %v196_v46 = vsel %vm195_vm7, %v164_v41, 63  ;;  %vm171_vm8 = vcmp.gt.s32.totalorder %v150_v34, 0  ;;  %vm169_vm9 = vcmp.gt.s32.totalorder %v149_v39, 0  ;;  %vm175_vm10 = vcmp.gt.s32.totalorder %v152_v40, 0  ;;  %v158_v60 = vld [vmem:[%s2082_s5 + $0x68] sm:$0xff]  ;;  %v157_v3 = vld [vmem:[%s2082_s5 + $0x60] sm:$0xff] }
  0x1e   : > { %v172_v49 = vsel %vm171_vm8, %v150_v34, 0  ;;  %v170_v50 = vsel %vm169_vm9, %v149_v39, 0  ;;  %v176_v51 = vsel %vm175_vm10, %v152_v40, 0  ;;  %vm173_vm11 = vcmp.gt.s32.totalorder %v151_v42, 0  ;;  %v160_v4 = vld [vmem:[%s2082_s5 + $0x78] sm:$0xff]  ;;  %v159_v6 = vld [vmem:[%s2082_s5 + $0x70] sm:$0xff] }
  0x1f   : > { %vm203_vm12 = vcmp.lt.s32.totalorder %v172_v49, 63  ;;  %vm201_vm13 = vcmp.lt.s32.totalorder %v170_v50, 63  ;;  %vm207_vm14 = vcmp.lt.s32.totalorder %v176_v51, 63  ;;  %v174_v57 = vsel %vm173_vm11, %v151_v42, 0  ;;  %s1922_s5 = sshll.u32 %s1984_s4, 4  ;;  %s1923_s5 = int_to_ptr.vmem [resolvable:$false] %s1922_s5 }
  0x20   : > { %v204_v56 = vsel %vm203_vm12, %v172_v49, 63  ;;  %v202_v59 = vsel %vm201_vm13, %v170_v50, 63  ;;  %vm179_vm15 = vcmp.gt.s32.totalorder %v154_v47, 0  ;;  %vm177_vm0 = vcmp.gt.s32.totalorder %v153_v52, 0  ;;  %s1924_s6 = scalar_lea.vmem %s1923_s5, 4096  ;;  %p1925_p0 = scmp.lt.s32.totalorder %s2398_s27, %s1923_s5 }
  0x21   : > { %237 = vperm.xlu1 %1917, %v200_v45   ;;  %231 = vperm.xlu0 %1916, %v196_v46   ;;  %vm183_vm1 = vcmp.gt.s32.totalorder %v156_v53, 0  ;;  %v180_v61 = vsel %vm179_vm15, %v154_v47, 0  ;;  %v178_v62 = vsel %vm177_vm0, %v153_v52, 0  ;;  %vm181_vm2 = vcmp.gt.s32.totalorder %v155_v54, 0  ;;  %p1926_p1 = scmp.lt.s32.totalorder %s1924_s6, %s1918_s3 }
  0x22   : > { %v184_v63 = vsel %vm183_vm1, %v156_v53, 0  ;;  %vm205_vm3 = vcmp.lt.s32.totalorder %v174_v57, 63  ;;  %v182_v5 = vsel %vm181_vm2, %v155_v54, 0  ;;  %v208_v10 = vsel %vm207_vm14, %v176_v51, 63 }
  0x23   : > { %vm211_vm4 = vcmp.lt.s32.totalorder %v180_v61, 63  ;;  %vm209_vm5 = vcmp.lt.s32.totalorder %v178_v62, 63  ;;  %vm215_vm6 = vcmp.lt.s32.totalorder %v184_v63, 63  ;;  %vm213_vm7 = vcmp.lt.s32.totalorder %v182_v5, 63  ;;  %p1927_p2 = por %p1926_p1, %p1925_p0 }
  0x24   : > { %vm187_vm8 = vcmp.gt.s32.totalorder %v158_v60, 0  ;;  %vm185_vm9 = vcmp.gt.s32.totalorder %v157_v3, 0  ;;  %vm191_vm10 = vcmp.gt.s32.totalorder %v160_v4, 0  ;;  %v206_v11 = vsel %vm205_vm3, %v174_v57, 63 }
  0x25   : > { %243 = vperm.xlu1 %1917, %v204_v56   ;;  %240 = vperm.xlu0 %1916, %v202_v59   ;;  %v188_v12 = vsel %vm187_vm8, %v158_v60, 0  ;;  %v186_v13 = vsel %vm185_vm9, %v157_v3, 0  ;;  %vm189_vm11 = vcmp.gt.s32.totalorder %v159_v6, 0  ;;  %v2115_v14 = vsel %vm191_vm10, %v160_v4, 0  ;;  %p1928_p3 = pnand %p1927_p2, %p1921_p13 }
  0x26   : > { %vm219_vm12 = vcmp.lt.s32.totalorder %v188_v12, 63  ;;  %vm217_vm13 = vcmp.lt.s32.totalorder %v186_v13, 63  ;;  %v2117_v15 = vsel %vm189_vm11, %v159_v6, 0  ;;  %v212_v16 = vsel %vm211_vm4, %v180_v61, 63 }
  0x27   : > { %v210_v17 = vsel %vm209_vm5, %v178_v62, 63  ;;  %v216_v18 = vsel %vm215_vm6, %v184_v63, 63  ;;  %v214_v19 = vsel %vm213_vm7, %v182_v5, 63  ;;  %v220_v21 = vsel %vm219_vm12, %v188_v12, 63 }
  0x28   : > { %v578_v24 = vand.u32 255, %v570_v9  ;;  %v218_v26 = vsel %vm217_vm13, %v186_v13, 63  ;;  %vm223_vm14 = vcmp.lt.s32.totalorder %v2115_v14, 63  ;;  %vm221_vm15 = vcmp.lt.s32.totalorder %v2117_v15, 63 }
  0x29   : > { %249 = vperm.xlu1 %1917, %v208_v10   ;;  %246 = vperm.xlu0 %1916, %v206_v11   ;;  %v345_v28 = vand.u32 255, %v2125_v20  ;;  %v346_v29 = vand.u32 255, %v2130_v25  ;;  %v1689_v30 = vpack.c.bf16 %v352_v22, %v351_v58  ;;  %v571_v33 = vshra.s32 %v2125_v20, 8 }
  0x2a   : > { %v586_v32 = vcvt.s32.f32 %v578_v24  ;;  %v572_v36 = vshra.s32 %v2130_v25, 8  ;;  %v782_v37 = vshra.s32 %v2054_v0, 16  ;;  %v783_v40 = vshra.s32 %v2059_v1, 16 }
  0x2b   : > { %v353_v34 = vcvt.s32.f32 %v345_v28  ;;  %v354_v35 = vcvt.s32.f32 %v346_v29  ;;  %v579_v39 = vand.u32 255, %v571_v33  ;;  %v1395_v41 = vshrl.u32 %v2054_v0, 24  ;;  %1690 = vmatprep.subr.bf16.mxu0 %v1689_v30 }
  0x2c   : > { %v1705_v38 = vpack.c.bf16 %v586_v32, %v585_v31  ;;  %v580_v43 = vand.u32 255, %v572_v36  ;;  %v790_v44 = vand.u32 255, %v782_v37  ;;  %v1396_v45 = vshrl.u32 %v2059_v1, 24  ;;  %1692 = vmatpush3.bf16.msra.mxu0 %v1689_v30 }
  0x2d   : > { %255 = vperm.xlu1 %1917, %v212_v16   ;;  %252 = vperm.xlu0 %1916, %v210_v17   ;;  %v1693_v42 = vpack.c.bf16 %v354_v35, %v353_v34  ;;  %v587_v46 = vcvt.s32.f32 %v579_v39  ;;  %v791_v47 = vand.u32 255, %v783_v40  ;;  %v1015_v49 = vcvt.s32.f32 %v1395_v41 }
  0x2e   : > { %1706 = vmatprep.subr.bf16.mxu1 %v1705_v38  ;;  %v784_v50 = vshra.s32 %v2064_v2, 16  ;;  %v588_v51 = vcvt.s32.f32 %v580_v43  ;;  %v798_v52 = vcvt.s32.f32 %v790_v44  ;;  %v1016_v53 = vcvt.s32.f32 %v1396_v45 }
  0x2f   : > { %1708 = vmatpush3.bf16.msra.mxu1 %v1705_v38  ;;  %1694 = vmatprep.subr.bf16.mxu0 %v1693_v42  ;;  %v785_v0 = vshra.s32 %v2073_v8, 16  ;;  %v799_v54 = vcvt.s32.f32 %v791_v47  ;;  %v1397_v1 = vshrl.u32 %v2064_v2, 24  ;;  %v1398_v56 = vshrl.u32 %v2073_v8, 24 }
  0x30   : > { %v792_v55 = vand.u32 255, %v784_v50  ;;  %v1709_v57 = vpack.c.bf16 %v588_v51, %v587_v46  ;;  %v2146_v58 = vpack.c.bf16 %v1016_v53, %v1015_v49  ;;  %v786_v60 = vshra.s32 %v2087_v27, 16  ;;  %1696 = vmatpush3.bf16.msra.mxu0 %v1693_v42 }
  0x31   : > { %261 = vperm.xlu1 %1917, %v216_v18   ;;  %258 = vperm.xlu0 %1916, %v214_v19   ;;  %v793_v59 = vand.u32 255, %v785_v0  ;;  %v1713_v61 = vpack.c.bf16 %v799_v54, %v798_v52  ;;  %v1017_v63 = vcvt.s32.f32 %v1397_v1  ;;  %v1018_v3 = vcvt.s32.f32 %v1398_v56 }
  0x32   : > { %v800_v62 = vcvt.s32.f32 %v792_v55  ;;  %1710 = vmatprep.subr.bf16.mxu1 %v1709_v57  ;;  %v787_v5 = vshra.s32 %v2102_v48, 16  ;;  %v794_v6 = vand.u32 255, %v786_v60  ;;  %v224_v2 = vsel %vm223_vm14, %v2115_v14, 63 }
  0x33   : > { %v801_v4 = vcvt.s32.f32 %v793_v59  ;;  %v222_v8 = vsel %vm221_vm15, %v2117_v15, 63  ;;  %v2156_v7 = vpack.c.bf16 %v1018_v3, %v1017_v63  ;;  %1712 = vmatpush3.bf16.msra.mxu1 %v1709_v57  ;;  %1714 = vmatprep.subr.bf16.mxu0 %v1713_v61  ;;  %v1399_v12 = vshrl.u32 %v2087_v27, 24 }
  0x34   : > { %v795_v10 = vand.u32 255, %v787_v5  ;;  %v802_v11 = vcvt.s32.f32 %v794_v6  ;;  %1730 = vmatprep.subr.bf16.mxu1 %v2146_v58  ;;  %v1400_v13 = vshrl.u32 %v2102_v48, 24  ;;  %v788_v17 = vshra.s32 %v2125_v20, 16 }
  0x35   : > { %267 = vperm.xlu1 %1917, %v220_v21   ;;  %264 = vperm.xlu0 %1916, %v218_v26   ;;  %v2158_v9 = vpack.c.bf16 %v801_v4, %v800_v62  ;;  %v1019_v14 = vcvt.s32.f32 %v1399_v12  ;;  %v789_v15 = vshra.s32 %v2130_v25, 16  ;;  %v1402_v24 = vshrl.u32 %v2130_v25, 24 }
  0x36   : > { %v803_v16 = vcvt.s32.f32 %v795_v10  ;;  %v1020_v18 = vcvt.s32.f32 %v1400_v13  ;;  %v796_v21 = vand.u32 255, %v788_v17  ;;  %v1021_v28 = vcvt.s32.f32 %v1401_v23 }
  0x37   : > { %v797_v22 = vand.u32 255, %v789_v15  ;;  %v1022_v29 = vcvt.s32.f32 %v1402_v24  ;;  %v225_v32 = vlaneseq  ;;  %vm355_vm0 = vcmask 523264  }
  0x38   : > { %v2165_v19 = vpack.c.bf16 %v803_v16, %v802_v11  ;;  %v1737_v27 = vpack.c.bf16 %v1020_v18, %v1019_v14  ;;  %v804_v26 = vcvt.s32.f32 %v796_v21  ;;  %v1983_v20 = vmov 0.0  }
  0x39   : > { %273 = vperm.xlu1 %1917, %v224_v2   ;;  %270 = vperm.xlu0 %1916, %v222_v8   ;;  %v805_v48 = vcvt.s32.f32 %v797_v22  ;;  %v2171_v31 = vpack.c.bf16 %v1022_v29, %v1021_v28  ;;  %v2173_v33 = vand.u32 127, %v225_v32 }
  0x3b   : > { %v2169_v30 = vpack.c.bf16 %v805_v48, %v804_v26 }
  0x9c   : > { %v235_v34 = vpop.permute.xlu1 %234  ;;  %v229_v35 = vpop.permute.xlu0 %228 }
  0x9d   : > { %vm275_vm1 = vcmp.eq.s32.totalorder %v229_v35, %v2173_v33  ;;  %vm277_vm2 = vcmp.eq.s32.totalorder %v235_v34, %v2173_v33 }
  0x9e   : > { %v2178_v25 = vsel %vm275_vm1, 1.0, %v1983_v20  ;;  %v2185_v38 = vsel %vm277_vm2, 1.0, %v1983_v20 }
  0x9f   : > { %1537 = vmatprep.mubr.msk.f32.mxu0 %vm355_vm0, %v2178_v25  ;;  %1577 = vmatprep.mubr.msk.f32.mxu1 %vm355_vm0, %v2178_v25 }
  0xa0   : > { %v238_v36 = vpop.permute.xlu1 %237  ;;  %v232_v37 = vpop.permute.xlu0 %231 }
  0xa1   : > { %vm276_vm3 = vcmp.eq.s32.totalorder %v232_v37, %v2173_v33  ;;  %vm278_vm4 = vcmp.eq.s32.totalorder %v238_v36, %v2173_v33 }
  0xa2   : > { %v2189_v39 = vsel %vm276_vm3, 1.0, %v1983_v20  ;;  %v2203_v42 = vsel %vm278_vm4, 1.0, %v1983_v20 }
  0xa3   : > { %1538 = vmatmul.mubr.msk.f32.vlgmr.msra.gmra.mrb[0].mxu0 %vm355_vm0, %v2189_v39  ;;  %1578 = vmatmul.mubr.msk.f32.vlgmr.msra.gmra.mrb[0].mxu1 %vm355_vm0, %v2189_v39 }
  0xa4   : > { %1716 = vmatpush3.bf16.msra.mxu0 %v1713_v61  ;;  %v244_v40 = vpop.permute.xlu1 %243  ;;  %1540 = vmatprep.mubr.msk.f32.mxu0 %vm355_vm0, %v2185_v38  ;;  %v241_v41 = vpop.permute.xlu0 %240 }
  0xa5   : > { %1580 = vmatprep.mubr.msk.f32.mxu1 %vm355_vm0, %v2185_v38  ;;  %vm279_vm5 = vcmp.eq.s32.totalorder %v241_v41, %v2173_v33  ;;  %1732 = vmatpush3.bf16.msra.mxu1 %v2146_v58  ;;  %vm280_vm6 = vcmp.eq.s32.totalorder %v244_v40, %v2173_v33 }
  0xa6   : > { %v2206_v43 = vsel %vm279_vm5, 1.0, %v1983_v20  ;;  %1718 = vmatprep.subr.bf16.mxu0 %v2158_v9  ;;  %1734 = vmatprep.subr.bf16.mxu1 %v2156_v7  ;;  %v2223_v46 = vsel %vm280_vm6, 1.0, %v1983_v20 }
  0xa7   : > { %1541 = vmatmul.mubr.msk.f32.gmra.mrb[2].mxu0 %vm355_vm0, %v2203_v42  ;;  %1581 = vmatmul.mubr.msk.f32.gmra.mrb[2].mxu1 %vm355_vm0, %v2203_v42 }
  0xa8   : > { %v250_v44 = vpop.permute.xlu1 %249  ;;  %1543 = vmatprep.mubr.msk.f32.mxu0 %vm355_vm0, %v2206_v43  ;;  %1583 = vmatprep.mubr.msk.f32.mxu1 %vm355_vm0, %v2206_v43  ;;  %v247_v45 = vpop.permute.xlu0 %246 }
  0xa9   : > { %vm281_vm7 = vcmp.eq.s32.totalorder %v247_v45, %v2173_v33  ;;  %1720 = vmatpush3.bf16.msra.mxu0 %v2158_v9  ;;  %1736 = vmatpush3.bf16.msra.mxu1 %v2156_v7  ;;  %vm282_vm8 = vcmp.eq.s32.totalorder %v250_v44, %v2173_v33 }
  0xaa   : > { %v2226_v47 = vsel %vm281_vm7, 1.0, %v1983_v20  ;;  %1722 = vmatprep.subr.bf16.mxu0 %v2165_v19  ;;  %1738 = vmatprep.subr.bf16.mxu1 %v1737_v27  ;;  %v1338_v51 = vsel %vm282_vm8, 1.0, %v1983_v20 }
  0xab   : > { %1544 = vmatmul.mubr.msk.f32.gmra.mrb[4].mxu0 %vm355_vm0, %v2223_v46  ;;  %1584 = vmatmul.mubr.msk.f32.gmra.mrb[4].mxu1 %vm355_vm0, %v2223_v46 }
  0xac   : > { %v256_v49 = vpop.permute.xlu1 %255  ;;  %1546 = vmatprep.mubr.msk.f32.mxu0 %vm355_vm0, %v2226_v47  ;;  %1586 = vmatprep.mubr.msk.f32.mxu1 %vm355_vm0, %v2226_v47  ;;  %v253_v50 = vpop.permute.xlu0 %252 }
  0xad   : > { %vm283_vm9 = vcmp.eq.s32.totalorder %v253_v50, %v2173_v33  ;;  %1724 = vmatpush3.bf16.msra.mxu0 %v2165_v19  ;;  %1740 = vmatpush3.bf16.msra.mxu1 %v1737_v27  ;;  %vm284_vm10 = vcmp.eq.s32.totalorder %v256_v49, %v2173_v33 }
  0xae   : > { %v1339_v52 = vsel %vm283_vm9, 1.0, %v1983_v20  ;;  %1726 = vmatprep.subr.bf16.mxu0 %v2169_v30  ;;  %1742 = vmatprep.subr.bf16.mxu1 %v2171_v31  ;;  %v1340_v54 = vsel %vm284_vm10, 1.0, %v1983_v20 }
  0xaf   : > { %1547 = vmatmul.mubr.msk.f32.gmra.mrb[6].mxu0 %vm355_vm0, %v1338_v51  ;;  %1587 = vmatmul.mubr.msk.f32.gmra.mrb[6].mxu1 %vm355_vm0, %v1338_v51 }
  0xb0   : > { %v262_v53 = vpop.permute.xlu1 %261  ;;  %1549 = vmatprep.mubr.msk.f32.mxu0 %vm355_vm0, %v1339_v52  ;;  %1589 = vmatprep.mubr.msk.f32.mxu1 %vm355_vm0, %v1339_v52  ;;  %v259_v0 = vpop.permute.xlu0 %258 }
  0xb1   : > { %vm285_vm11 = vcmp.eq.s32.totalorder %v259_v0, %v2173_v33  ;;  %1728 = vmatpush3.bf16.msra.mxu0 %v2169_v30  ;;  %1744 = vmatpush3.bf16.msra.mxu1 %v2171_v31  ;;  %vm286_vm12 = vcmp.eq.s32.totalorder %v262_v53, %v2173_v33 }
  0xb2   : > { %v1341_v55 = vsel %vm285_vm11, 1.0, %v1983_v20  ;;  %v1342_v57 = vsel %vm286_vm12, 1.0, %v1983_v20 }
  0xb3   : > { %1550 = vmatmul.mubr.msk.f32.gmra.mrb[8].mxu0 %vm355_vm0, %v1340_v54  ;;  %1590 = vmatmul.mubr.msk.f32.gmra.mrb[8].mxu1 %vm355_vm0, %v1340_v54 }
  0xb4   : > { %v268_v1 = vpop.permute.xlu1 %267  ;;  %1552 = vmatprep.mubr.msk.f32.mxu0 %vm355_vm0, %v1341_v55  ;;  %1592 = vmatprep.mubr.msk.f32.mxu1 %vm355_vm0, %v1341_v55  ;;  %v265_v56 = vpop.permute.xlu0 %264 }
  0xb5   : > { %vm287_vm13 = vcmp.eq.s32.totalorder %v265_v56, %v2173_v33  ;;  %vm288_vm14 = vcmp.eq.s32.totalorder %v268_v1, %v2173_v33 }
  0xb6   : > { %v1343_v58 = vsel %vm287_vm13, 1.0, %v1983_v20  ;;  %v1344_v61 = vsel %vm288_vm14, 1.0, %v1983_v20 }
  0xb7   : > { %1553 = vmatmul.mubr.msk.f32.gmra.mrb[10].mxu0 %vm355_vm0, %v1342_v57  ;;  %1593 = vmatmul.mubr.msk.f32.gmra.mrb[10].mxu1 %vm355_vm0, %v1342_v57 }
  0xb8   : > { %v274_v59 = vpop.permute.xlu1 %273  ;;  %1555 = vmatprep.mubr.msk.f32.mxu0 %vm355_vm0, %v1343_v58  ;;  %1595 = vmatprep.mubr.msk.f32.mxu1 %vm355_vm0, %v1343_v58  ;;  %v271_v60 = vpop.permute.xlu0 %270 }
  0xb9   : > { %vm289_vm15 = vcmp.eq.s32.totalorder %v271_v60, %v2173_v33  ;;  %vm290_vm1 = vcmp.eq.s32.totalorder %v274_v59, %v2173_v33 }
  0xba   : > { %v1345_v62 = vsel %vm289_vm15, 1.0, %v1983_v20  ;;  %v1346_v63 = vsel %vm290_vm1, 1.0, %v1983_v20 }
  0xbb   : > { %1556 = vmatmul.mubr.msk.f32.gmra.mrb[12].mxu0 %vm355_vm0, %v1344_v61  ;;  %1596 = vmatmul.mubr.msk.f32.gmra.mrb[12].mxu1 %vm355_vm0, %v1344_v61 }
  0xbc   : > { %1558 = vmatprep.mubr.msk.f32.mxu0 %vm355_vm0, %v1345_v62  ;;  %1598 = vmatprep.mubr.msk.f32.mxu1 %vm355_vm0, %v1345_v62 }
  0xbf   : > { %1559 = vmatmul.mubr.msk.f32.gmra.mrb[14].mxu0 %vm355_vm0, %v1346_v63  ;;  %1599 = vmatmul.mubr.msk.f32.gmra.mrb[14].mxu1 %vm355_vm0, %v1346_v63 }
  0xc0   : > { %1617 = vmatprep.mubr.msk.f32.mxu0 %vm355_vm0, %v2178_v25  ;;  %1657 = vmatprep.mubr.msk.f32.mxu1 %vm355_vm0, %v2178_v25 }
  0xc3   : > { %1618 = vmatmul.mubr.msk.f32.vlgmr.msra.gmra.mrb[16].mxu0 %vm355_vm0, %v2189_v39  ;;  %1658 = vmatmul.mubr.msk.f32.vlgmr.msra.gmra.mrb[16].mxu1 %vm355_vm0, %v2189_v39 }
  0xc4   : > { %1620 = vmatprep.mubr.msk.f32.mxu0 %vm355_vm0, %v2185_v38  ;;  %1660 = vmatprep.mubr.msk.f32.mxu1 %vm355_vm0, %v2185_v38 }
  0xc7   : > { %1621 = vmatmul.mubr.msk.f32.gmra.mrb[18].mxu0 %vm355_vm0, %v2203_v42  ;;  %1661 = vmatmul.mubr.msk.f32.gmra.mrb[18].mxu1 %vm355_vm0, %v2203_v42 }
  0xc8   : > { %1623 = vmatprep.mubr.msk.f32.mxu0 %vm355_vm0, %v2206_v43  ;;  %1663 = vmatprep.mubr.msk.f32.mxu1 %vm355_vm0, %v2206_v43 }
  0xcb   : > { %1624 = vmatmul.mubr.msk.f32.gmra.mrb[20].mxu0 %vm355_vm0, %v2223_v46  ;;  %1664 = vmatmul.mubr.msk.f32.gmra.mrb[20].mxu1 %vm355_vm0, %v2223_v46 }
  0xcc   : > { %1626 = vmatprep.mubr.msk.f32.mxu0 %vm355_vm0, %v2226_v47  ;;  %1666 = vmatprep.mubr.msk.f32.mxu1 %vm355_vm0, %v2226_v47 }
  0xcf   : > { %1627 = vmatmul.mubr.msk.f32.gmra.mrb[22].mxu0 %vm355_vm0, %v1338_v51  ;;  %1667 = vmatmul.mubr.msk.f32.gmra.mrb[22].mxu1 %vm355_vm0, %v1338_v51 }
  0xd0   : > { %1629 = vmatprep.mubr.msk.f32.mxu0 %vm355_vm0, %v1339_v52  ;;  %1669 = vmatprep.mubr.msk.f32.mxu1 %vm355_vm0, %v1339_v52 }
  0xd3   : > { %1630 = vmatmul.mubr.msk.f32.gmra.mrb[24].mxu0 %vm355_vm0, %v1340_v54  ;;  %1670 = vmatmul.mubr.msk.f32.gmra.mrb[24].mxu1 %vm355_vm0, %v1340_v54 }
  0xd4   : > { %1632 = vmatprep.mubr.msk.f32.mxu0 %vm355_vm0, %v1341_v55  ;;  %1672 = vmatprep.mubr.msk.f32.mxu1 %vm355_vm0, %v1341_v55 }
  0xd7   : > { %1633 = vmatmul.mubr.msk.f32.gmra.mrb[26].mxu0 %vm355_vm0, %v1342_v57  ;;  %1673 = vmatmul.mubr.msk.f32.gmra.mrb[26].mxu1 %vm355_vm0, %v1342_v57 }
  0xd8   : > { %1635 = vmatprep.mubr.msk.f32.mxu0 %vm355_vm0, %v1343_v58  ;;  %1675 = vmatprep.mubr.msk.f32.mxu1 %vm355_vm0, %v1343_v58 }
  0xdb   : > { %1636 = vmatmul.mubr.msk.f32.gmra.mrb[28].mxu0 %vm355_vm0, %v1344_v61  ;;  %1676 = vmatmul.mubr.msk.f32.gmra.mrb[28].mxu1 %vm355_vm0, %v1344_v61 }
  0xdc   : > { %1638 = vmatprep.mubr.msk.f32.mxu0 %vm355_vm0, %v1345_v62  ;;  %1678 = vmatprep.mubr.msk.f32.mxu1 %vm355_vm0, %v1345_v62 }
  0xdf   : > { %1639 = vmatmul.mubr.msk.f32.gmra.mrb[30].mxu0 %vm355_vm0, %v1346_v63  ;;  %1679 = vmatmul.mubr.msk.f32.gmra.mrb[30].mxu1 %vm355_vm0, %v1346_v63 }
 0x176   : > { %v1539_v3 = vpop.f32.mrb[0].mxu0  ;;  %v1579_v4 = vpop.f32.mrb[0].mxu1 }
 0x177   : > { %v1747_v5 = vtrunc.f32 %v1539_v3  ;;  %v1779_v6 = vtrunc.f32 %v1579_v4  ;;  %v470_v2 = vpop.f32.mrb[1].mxu0  ;;  %v655_v8 = vpop.f32.mrb[1].mxu1 }
 0x178   : > { %v1745_v7 = vtrunc.f32 %v470_v2  ;;  %v1777_v9 = vtrunc.f32 %v655_v8 }
 0x179   : > { %v1780_v10 = vcvt.f32.s32 %v1779_v6  ;;  %v1748_v16 = vcvt.f32.s32 %v1747_v5 }
 0x17a   : > { %v1778_v11 = vcvt.f32.s32 %v1777_v9  ;;  %v1542_v12 = vpop.f32.mrb[2].mxu0  ;;  %v1582_v13 = vpop.f32.mrb[2].mxu1  ;;  %v1746_v21 = vcvt.f32.s32 %v1745_v7 }
 0x17b   : > { %v751_v14 = vshll.u32 %v1780_v10, 8  ;;  %v1751_v17 = vtrunc.f32 %v1542_v12  ;;  %v1783_v15 = vtrunc.f32 %v1582_v13  ;;  %v480_v18 = vpop.f32.mrb[3].mxu0  ;;  %v665_v19 = vpop.f32.mrb[3].mxu1 }
 0x17c   : > { %v750_v22 = vshll.u32 %v1778_v11, 8  ;;  %v1749_v23 = vtrunc.f32 %v480_v18  ;;  %v1781_v27 = vtrunc.f32 %v665_v19 }
 0x17d   : > { %v2324_v24 = vor.u32 %v1748_v16, %v751_v14  ;;  %v1784_v26 = vcvt.f32.s32 %v1783_v15  ;;  %v1752_v31 = vcvt.f32.s32 %v1751_v17 }
 0x17e   : > { %v2326_v48 = vor.u32 %v1746_v21, %v750_v22  ;;  %v1782_v28 = vcvt.f32.s32 %v1781_v27  ;;  %v1545_v29 = vpop.f32.mrb[4].mxu0  ;;  %v1585_v30 = vpop.f32.mrb[4].mxu1  ;;  %v1750_v25 = vcvt.f32.s32 %v1749_v23 }
 0x17f   : > { %v753_v32 = vshll.u32 %v1784_v26, 8  ;;  %v1755_v33 = vtrunc.f32 %v1545_v29  ;;  %v1787_v34 = vtrunc.f32 %v1585_v30  ;;  %v490_v35 = vpop.f32.mrb[5].mxu0  ;;  %v675_v20 = vpop.f32.mrb[5].mxu1 }
 0x180   : > { %v752_v36 = vshll.u32 %v1782_v28, 8  ;;  %v1753_v37 = vtrunc.f32 %v490_v35  ;;  %v1785_v38 = vtrunc.f32 %v675_v20 }
 0x181   : > { %v2328_v39 = vor.u32 %v1752_v31, %v753_v32  ;;  %v1788_v40 = vcvt.f32.s32 %v1787_v34  ;;  %v1756_v45 = vcvt.f32.s32 %v1755_v33 }
 0x182   : > { %v2330_v41 = vor.u32 %v1750_v25, %v752_v36  ;;  %v1786_v42 = vcvt.f32.s32 %v1785_v38  ;;  %v1548_v43 = vpop.f32.mrb[6].mxu0  ;;  %v1588_v44 = vpop.f32.mrb[6].mxu1  ;;  %v1754_v52 = vcvt.f32.s32 %v1753_v37 }
 0x183   : > { %v755_v46 = vshll.u32 %v1788_v40, 8  ;;  %v1759_v47 = vtrunc.f32 %v1548_v43  ;;  %v1791_v49 = vtrunc.f32 %v1588_v44  ;;  %v500_v50 = vpop.f32.mrb[7].mxu0  ;;  %v685_v51 = vpop.f32.mrb[7].mxu1 }
 0x184   : > { %v754_v53 = vshll.u32 %v1786_v42, 8  ;;  %v1757_v0 = vtrunc.f32 %v500_v50  ;;  %v1789_v54 = vtrunc.f32 %v685_v51 }
 0x185   : > { %v2332_v55 = vor.u32 %v1756_v45, %v755_v46  ;;  %v1792_v1 = vcvt.f32.s32 %v1791_v49  ;;  %v1760_v60 = vcvt.f32.s32 %v1759_v47 }
 0x186   : > { %v2334_v56 = vor.u32 %v1754_v52, %v754_v53  ;;  %v1790_v57 = vcvt.f32.s32 %v1789_v54  ;;  %v1551_v58 = vpop.f32.mrb[8].mxu0  ;;  %v1591_v59 = vpop.f32.mrb[8].mxu1  ;;  %v1758_v5 = vcvt.f32.s32 %v1757_v0 }
 0x187   : > { %v757_v61 = vshll.u32 %v1792_v1, 8  ;;  %v1763_v62 = vtrunc.f32 %v1551_v58  ;;  %v1795_v63 = vtrunc.f32 %v1591_v59  ;;  %v510_v3 = vpop.f32.mrb[9].mxu0  ;;  %v695_v4 = vpop.f32.mrb[9].mxu1 }
 0x188   : > { %v756_v6 = vshll.u32 %v1790_v57, 8  ;;  %v1761_v2 = vtrunc.f32 %v510_v3  ;;  %v1793_v8 = vtrunc.f32 %v695_v4 }
 0x189   : > { %v2336_v7 = vor.u32 %v1760_v60, %v757_v61  ;;  %v1796_v9 = vcvt.f32.s32 %v1795_v63  ;;  %v1764_v16 = vcvt.f32.s32 %v1763_v62 }
 0x18a   : > { %v2338_v10 = vor.u32 %v1758_v5, %v756_v6  ;;  %v1794_v11 = vcvt.f32.s32 %v1793_v8  ;;  %v1554_v12 = vpop.f32.mrb[10].mxu0  ;;  %v1594_v13 = vpop.f32.mrb[10].mxu1  ;;  %v1762_v21 = vcvt.f32.s32 %v1761_v2 }
 0x18b   : > { %v759_v14 = vshll.u32 %v1796_v9, 8  ;;  %v1767_v17 = vtrunc.f32 %v1554_v12  ;;  %v1799_v15 = vtrunc.f32 %v1594_v13  ;;  %v520_v18 = vpop.f32.mrb[11].mxu0  ;;  %v705_v19 = vpop.f32.mrb[11].mxu1 }
 0x18c   : > { %v758_v22 = vshll.u32 %v1794_v11, 8  ;;  %v1765_v23 = vtrunc.f32 %v520_v18  ;;  %v1797_v27 = vtrunc.f32 %v705_v19 }
 0x18d   : > { %v2340_v26 = vor.u32 %v1764_v16, %v759_v14  ;;  %v1800_v28 = vcvt.f32.s32 %v1799_v15  ;;  %v1768_v33 = vcvt.f32.s32 %v1767_v17 }
 0x18e   : > { %v2342_v29 = vor.u32 %v1762_v21, %v758_v22  ;;  %v1798_v30 = vcvt.f32.s32 %v1797_v27  ;;  %v1557_v31 = vpop.f32.mrb[12].mxu0  ;;  %v1597_v32 = vpop.f32.mrb[12].mxu1  ;;  %v1766_v37 = vcvt.f32.s32 %v1765_v23 }
 0x18f   : > { %v761_v34 = vshll.u32 %v1800_v28, 8  ;;  %v1771_v35 = vtrunc.f32 %v1557_v31  ;;  %v1803_v20 = vtrunc.f32 %v1597_v32  ;;  %v530_v25 = vpop.f32.mrb[13].mxu0  ;;  %v715_v36 = vpop.f32.mrb[13].mxu1 }
 0x190   : > { %v760_v38 = vshll.u32 %v1798_v30, 8  ;;  %v1769_v40 = vtrunc.f32 %v530_v25  ;;  %v1801_v42 = vtrunc.f32 %v715_v36 }
 0x191   : > { %v2344_v43 = vor.u32 %v1768_v33, %v761_v34  ;;  %v1804_v44 = vcvt.f32.s32 %v1803_v20  ;;  %v1772_v50 = vcvt.f32.s32 %v1771_v35 }
 0x192   : > { %v2346_v45 = vor.u32 %v1766_v37, %v760_v38  ;;  %v1802_v46 = vcvt.f32.s32 %v1801_v42  ;;  %v1560_v47 = vpop.f32.mrb[14].mxu0  ;;  %v1600_v49 = vpop.f32.mrb[14].mxu1  ;;  %v1770_v1 = vcvt.f32.s32 %v1769_v40 }
 0x193   : > { %v763_v51 = vshll.u32 %v1804_v44, 8  ;;  %v1775_v52 = vtrunc.f32 %v1560_v47  ;;  %v1807_v53 = vtrunc.f32 %v1600_v49  ;;  %v540_v0 = vpop.f32.mrb[15].mxu0  ;;  %v725_v54 = vpop.f32.mrb[15].mxu1 }
 0x194   : > { %v762_v57 = vshll.u32 %v1802_v46, 8  ;;  %v1773_v58 = vtrunc.f32 %v540_v0  ;;  %v1805_v59 = vtrunc.f32 %v725_v54 }
 0x195   : > { %v2348_v60 = vor.u32 %v1772_v50, %v763_v51  ;;  %v1808_v61 = vcvt.f32.s32 %v1807_v53  ;;  %v1776_v5 = vcvt.f32.s32 %v1775_v52 }
 0x196   : > { %v2350_v62 = vor.u32 %v1770_v1, %v762_v57  ;;  %v1806_v63 = vcvt.f32.s32 %v1805_v59  ;;  %v1619_v3 = vpop.f32.mrb[16].mxu0  ;;  %v1659_v4 = vpop.f32.mrb[16].mxu1  ;;  %v1774_v12 = vcvt.f32.s32 %v1773_v58 }
 0x197   : > { %v765_v6 = vshll.u32 %v1808_v61, 8  ;;  %v1811_v2 = vtrunc.f32 %v1619_v3  ;;  %v1843_v8 = vtrunc.f32 %v1659_v4  ;;  %v872_v9 = vpop.f32.mrb[17].mxu0  ;;  %v1089_v11 = vpop.f32.mrb[17].mxu1 }
 0x198   : > { %v764_v13 = vshll.u32 %v1806_v63, 8  ;;  %v1809_v16 = vtrunc.f32 %v872_v9  ;;  %v1841_v14 = vtrunc.f32 %v1089_v11 }
 0x199   : > { %v2353_v17 = vor.u32 %v1776_v5, %v765_v6  ;;  %v1812_v15 = vcvt.f32.s32 %v1811_v2  ;;  %v1844_v18 = vcvt.f32.s32 %v1843_v8 }
 0x19a   : > { %v2355_v19 = vor.u32 %v1774_v12, %v764_v13  ;;  %v1810_v21 = vcvt.f32.s32 %v1809_v16  ;;  %v1842_v22 = vcvt.f32.s32 %v1841_v14  ;;  %v1622_v23 = vpop.f32.mrb[18].mxu0  ;;  %v1662_v27 = vpop.f32.mrb[18].mxu1 }
 0x19b   : > { %v968_v28 = vshll.u32 %v1812_v15, 16  ;;  %v1815_v30 = vtrunc.f32 %v1622_v23  ;;  %v1847_v31 = vtrunc.f32 %v1662_v27  ;;  %v882_v32 = vpop.f32.mrb[19].mxu0  ;;  %v1099_v33 = vpop.f32.mrb[19].mxu1  ;;  %v1185_v36 = vshll.u32 %v1844_v18, 24 }
 0x19c   : > { %v967_v34 = vshll.u32 %v1810_v21, 16  ;;  %v1813_v35 = vtrunc.f32 %v882_v32  ;;  %v1845_v20 = vtrunc.f32 %v1099_v33  ;;  %v1184_v42 = vshll.u32 %v1842_v22, 24 }
 0x19d   : > { %v984_v25 = vor.u32 %v968_v28, %v2324_v24  ;;  %v1816_v37 = vcvt.f32.s32 %v1815_v30  ;;  %v1848_v38 = vcvt.f32.s32 %v1847_v31 }
 0x19e   : > { %v983_v40 = vor.u32 %v967_v34, %v2326_v48  ;;  %v1814_v44 = vcvt.f32.s32 %v1813_v35  ;;  %v1846_v46 = vcvt.f32.s32 %v1845_v20  ;;  %v1625_v47 = vpop.f32.mrb[20].mxu0  ;;  %v1665_v49 = vpop.f32.mrb[20].mxu1 }
 0x19f   : > { %v1201_v50 = vor.u32 %v1185_v36, %v984_v25  ;;  %v970_v51 = vshll.u32 %v1816_v37, 16  ;;  %v1819_v52 = vtrunc.f32 %v1625_v47  ;;  %v892_v53 = vpop.f32.mrb[21].mxu0  ;;  %v1109_v0 = vpop.f32.mrb[21].mxu1  ;;  %v1187_v1 = vshll.u32 %v1848_v38, 24 }
 0x1a0   : > { %v1200_v54 = vor.u32 %v1184_v42, %v983_v40  ;;  %v969_v57 = vshll.u32 %v1814_v44, 16  ;;  %v1851_v58 = vtrunc.f32 %v1665_v49  ;;  %v1817_v59 = vtrunc.f32 %v892_v53 }
 0x1a1   : > { %1233 = vst [vmem:[%s2361_s25 + $0x8] sm:$0xff] %v1201_v50  ;;  %v986_v24 = vor.u32 %v970_v51, %v2328_v39  ;;  %v1820_v48 = vcvt.f32.s32 %v1819_v52  ;;  %v1849_v61 = vtrunc.f32 %v1109_v0  ;;  %v1186_v3 = vshll.u32 %v1846_v46, 24 }
 0x1a2   : > { %1232 = vst [vmem:[%s2361_s25] sm:$0xff] %v1200_v54  ;;  %v985_v63 = vor.u32 %v969_v57, %v2330_v41  ;;  %v1852_v4 = vcvt.f32.s32 %v1851_v58  ;;  %v1628_v5 = vpop.f32.mrb[22].mxu0  ;;  %v1668_v6 = vpop.f32.mrb[22].mxu1  ;;  %v1818_v9 = vcvt.f32.s32 %v1817_v59 }
 0x1a3   : > { %v1203_v2 = vor.u32 %v1187_v1, %v986_v24  ;;  %v972_v8 = vshll.u32 %v1820_v48, 16  ;;  %v1850_v11 = vcvt.f32.s32 %v1849_v61  ;;  %v902_v12 = vpop.f32.mrb[23].mxu0  ;;  %v1119_v13 = vpop.f32.mrb[23].mxu1  ;;  %v1823_v39 = vtrunc.f32 %v1628_v5 }
 0x1a4   : > { %v1202_v16 = vor.u32 %v1186_v3, %v985_v63  ;;  %v1855_v14 = vtrunc.f32 %v1668_v6  ;;  %v1189_v18 = vshll.u32 %v1852_v4, 24  ;;  %v971_v21 = vshll.u32 %v1818_v9, 16 }
 0x1a5   : > { %1235 = vst [vmem:[%s2361_s25 + $0x18] sm:$0xff] %v1203_v2  ;;  %v988_v15 = vor.u32 %v972_v8, %v2332_v55  ;;  %v1821_v41 = vtrunc.f32 %v902_v12  ;;  %v1188_v22 = vshll.u32 %v1850_v11, 24  ;;  %v1824_v23 = vcvt.f32.s32 %v1823_v39 }
 0x1a6   : > { %1234 = vst [vmem:[%s2361_s25 + $0x10] sm:$0xff] %v1202_v16  ;;  %v1856_v27 = vcvt.f32.s32 %v1855_v14  ;;  %v1853_v28 = vtrunc.f32 %v1119_v13  ;;  %v1631_v30 = vpop.f32.mrb[24].mxu0  ;;  %v1671_v31 = vpop.f32.mrb[24].mxu1  ;;  %v987_v33 = vor.u32 %v971_v21, %v2334_v56 }
 0x1a7   : > { %v1205_v32 = vor.u32 %v1189_v18, %v988_v15  ;;  %v1822_v34 = vcvt.f32.s32 %v1821_v41  ;;  %v1827_v35 = vtrunc.f32 %v1631_v30  ;;  %v912_v20 = vpop.f32.mrb[25].mxu0  ;;  %v1129_v25 = vpop.f32.mrb[25].mxu1  ;;  %v974_v55 = vshll.u32 %v1824_v23, 16 }
 0x1a8   : > { %v1191_v36 = vshll.u32 %v1856_v27, 24  ;;  %v1854_v37 = vcvt.f32.s32 %v1853_v28  ;;  %v1859_v38 = vtrunc.f32 %v1671_v31  ;;  %v1204_v40 = vor.u32 %v1188_v22, %v987_v33 }
 0x1a9   : > { %1237 = vst [vmem:[%s2361_s25 + $0x28] sm:$0xff] %v1205_v32  ;;  %v973_v42 = vshll.u32 %v1822_v34, 16  ;;  %v1828_v44 = vcvt.f32.s32 %v1827_v35  ;;  %v1825_v46 = vtrunc.f32 %v912_v20  ;;  %v990_v47 = vor.u32 %v974_v55, %v2336_v7 }
 0x1aa   : > { %v1190_v49 = vshll.u32 %v1854_v37, 24  ;;  %v1860_v50 = vcvt.f32.s32 %v1859_v38  ;;  %v1857_v51 = vtrunc.f32 %v1129_v25  ;;  %v1634_v56 = vpop.f32.mrb[26].mxu0  ;;  %v1674_v52 = vpop.f32.mrb[26].mxu1  ;;  %1236 = vst [vmem:[%s2361_s25 + $0x20] sm:$0xff] %v1204_v40 }
 0x1ab   : > { %v989_v53 = vor.u32 %v973_v42, %v2338_v10  ;;  %v976_v0 = vshll.u32 %v1828_v44, 16  ;;  %v1826_v54 = vcvt.f32.s32 %v1825_v46  ;;  %v1831_v1 = vtrunc.f32 %v1634_v56  ;;  %v922_v57 = vpop.f32.mrb[27].mxu0  ;;  %v1139_v58 = vpop.f32.mrb[27].mxu1 }
 0x1ac   : > { %v1207_v24 = vor.u32 %v1191_v36, %v990_v47  ;;  %v1193_v48 = vshll.u32 %v1860_v50, 24  ;;  %v1858_v59 = vcvt.f32.s32 %v1857_v51  ;;  %v1863_v61 = vtrunc.f32 %v1674_v52 }
 0x1ad   : > { %v1206_v7 = vor.u32 %v1190_v49, %v989_v53  ;;  %v992_v63 = vor.u32 %v976_v0, %v2340_v26  ;;  %v975_v3 = vshll.u32 %v1826_v54, 16  ;;  %v1832_v4 = vcvt.f32.s32 %v1831_v1 }
 0x1ae   : > { %1239 = vst [vmem:[%s2361_s25 + $0x38] sm:$0xff] %v1207_v24  ;;  %v1192_v5 = vshll.u32 %v1858_v59, 24  ;;  %v1864_v6 = vcvt.f32.s32 %v1863_v61  ;;  %v1829_v10 = vtrunc.f32 %v922_v57  ;;  %v1861_v2 = vtrunc.f32 %v1139_v58  ;;  %v1637_v8 = vpop.f32.mrb[28].mxu0  ;;  %v1677_v9 = vpop.f32.mrb[28].mxu1 }
 0x1af   : > { %1238 = vst [vmem:[%s2361_s25 + $0x30] sm:$0xff] %v1206_v7  ;;  %v1209_v11 = vor.u32 %v1193_v48, %v992_v63  ;;  %v991_v12 = vor.u32 %v975_v3, %v2342_v29  ;;  %v978_v13 = vshll.u32 %v1832_v4, 16  ;;  %v1835_v16 = vtrunc.f32 %v1637_v8  ;;  %v932_v39 = vpop.f32.mrb[29].mxu0  ;;  %v1149_v14 = vpop.f32.mrb[29].mxu1 }
 0x1b0   : > { %v1195_v26 = vshll.u32 %v1864_v6, 24  ;;  %v1830_v15 = vcvt.f32.s32 %v1829_v10  ;;  %v1862_v18 = vcvt.f32.s32 %v1861_v2  ;;  %v1867_v21 = vtrunc.f32 %v1677_v9 }
 0x1b1   : > { %1241 = vst [vmem:[%s2361_s25 + $0x48] sm:$0xff] %v1209_v11  ;;  %v1208_v41 = vor.u32 %v1192_v5, %v991_v12  ;;  %v994_v22 = vor.u32 %v978_v13, %v2344_v43  ;;  %v1836_v23 = vcvt.f32.s32 %v1835_v16  ;;  %v1833_v27 = vtrunc.f32 %v932_v39 }
 0x1b2   : > { %v977_v28 = vshll.u32 %v1830_v15, 16  ;;  %v1194_v30 = vshll.u32 %v1862_v18, 24  ;;  %v1868_v31 = vcvt.f32.s32 %v1867_v21  ;;  %v1865_v29 = vtrunc.f32 %v1149_v14  ;;  %v1640_v32 = vpop.f32.mrb[30].mxu0  ;;  %v1680_v33 = vpop.f32.mrb[30].mxu1 }
 0x1b3   : > { %1240 = vst [vmem:[%s2361_s25 + $0x40] sm:$0xff] %v1208_v41  ;;  %v1211_v34 = vor.u32 %v1195_v26, %v994_v22  ;;  %v980_v35 = vshll.u32 %v1836_v23, 16  ;;  %v1834_v20 = vcvt.f32.s32 %v1833_v27  ;;  %v1839_v25 = vtrunc.f32 %v1640_v32  ;;  %v942_v55 = vpop.f32.mrb[31].mxu0  ;;  %v1159_v36 = vpop.f32.mrb[31].mxu1 }
 0x1b4   : > { %v993_v37 = vor.u32 %v977_v28, %v2346_v45  ;;  %v1197_v38 = vshll.u32 %v1868_v31, 24  ;;  %v1866_v43 = vcvt.f32.s32 %v1865_v29  ;;  %v1871_v40 = vtrunc.f32 %v1680_v33 }
 0x1b5   : > { %1243 = vst [vmem:[%s2361_s25 + $0x58] sm:$0xff] %v1211_v34  ;;  %v996_v42 = vor.u32 %v980_v35, %v2348_v60  ;;  %v979_v44 = vshll.u32 %v1834_v20, 16  ;;  %v1840_v46 = vcvt.f32.s32 %v1839_v25  ;;  %v1837_v47 = vtrunc.f32 %v942_v55 }
 0x1b6   : > { %v1210_v49 = vor.u32 %v1194_v30, %v993_v37  ;;  %v1196_v50 = vshll.u32 %v1866_v43, 24  ;;  %v1872_v51 = vcvt.f32.s32 %v1871_v40  ;;  %v1869_v56 = vtrunc.f32 %v1159_v36 }
 0x1b7   : > { %v1213_v52 = vor.u32 %v1197_v38, %v996_v42  ;;  %v995_v45 = vor.u32 %v979_v44, %v2350_v62  ;;  %v982_v53 = vshll.u32 %v1840_v46, 16  ;;  %v1838_v0 = vcvt.f32.s32 %v1837_v47 }
 0x1b8   : > { %1242 = vst [vmem:[%s2361_s25 + $0x50] sm:$0xff] %v1210_v49  ;;  %v1870_v54 = vcvt.f32.s32 %v1869_v56  ;;  %v1199_v57 = vshll.u32 %v1872_v51, 24 }
 0x1b9   : > { %1245 = vst [vmem:[%s2361_s25 + $0x68] sm:$0xff] %v1213_v52  ;;  %v1212_v60 = vor.u32 %v1196_v50, %v995_v45  ;;  %v998_v1 = vor.u32 %v982_v53, %v2353_v17  ;;  %v981_v58 = vshll.u32 %v1838_v0, 16 }
 0x1ba   : > { %v1198_v48 = vshll.u32 %v1870_v54, 24 }
 0x1bb   : > { %1244 = vst [vmem:[%s2361_s25 + $0x60] sm:$0xff] %v1212_v60  ;;  %v1215_v24 = vor.u32 %v1199_v57, %v998_v1  ;;  %v997_v62 = vor.u32 %v981_v58, %v2355_v19 }
 0x1bd   : > { %1247 = vst [vmem:[%s2361_s25 + $0x78] sm:$0xff] %v1215_v24  ;;  %v1214_v17 = vor.u32 %v1198_v48, %v997_v62 }
 0x1bf   : > { %1246 = vst [vmem:[%s2361_s25 + $0x70] sm:$0xff] %v1214_v17 }
 0x1c0   : > { %1931 = shalt.err (!%p1928_p3)
}
 0x1c1   : > { %s1932_s7 = scalar_lea.hbm %s2396_s30, 2048  ;;  %s1936_s16 = scalar_lea.hbm %s2447_s2, 4096 }
 0x1c2   : > { %p1933_p4 = scmp.ne.s32.totalorder %s2396_s30, %s1932_s7  ;;  %p1937_p9 = scmp.lt.u32.totalorder %s2396_s30, %s2447_s2 }
 0x1c3   : > { %p1938_p10 = scmp.lt.u32.totalorder %s1936_s16, %s1932_s7  ;;  %p1940_p12 = scmp.lt.u32.totalorder %s1932_s7, %s2396_s30 }
 0x1c4   : > { %p1934_p7 = pnand %p1933_p4, %p2040_p5 }
 0x1c5   : > { %p1939_p11 = por %p1938_p10, %p1937_p9 }
 0x1c6   : > { %p1935_p8 = pneg %p1934_p7 }
 0x1c7   : > { %p1941_p13 = por %p1940_p12, %p1939_p11 }
 0x1c9   : > { %p1942_p0 = pnand %p1941_p13, %p1935_p8 }
 0x1cb   : > { %1945 = shalt.err (!%p1942_p0)
}
 0x1cc   : > { %s1985_s22 = smov 128   ;;  %s1986_s23 = smov 8  }
 0x1cd   : > { %1873 = dma.vmem_to_hbm [thread:$0]  (%p2040_p5), %s2398_s27, 2048, %s2396_s30, %s2404_s13, %s1985_s22, %s1985_s22, %s1986_s23  }
 0x1ce PF: > { %p1879_p1 = scmp.ge.s32.totalorder %s1980_s12, 2  ;;  %s1277_s24 = sand.u32 1, %s1968_s9  }
 0x1cf   : > { %s1278_s25 = scalar_lea.sflag [#allocation3], %s1277_s24 }
 0x1d0   : > { %p1876_p2 = pnand %p1879_p1, %p2044_p6 }
 0x1d2   : > { %1963 = dma.done.wait (!%p1876_p2), %s1278_s25, 2048  }
 0x1d3   : > { %1965 = vsyncadd (!%p1876_p2), %s1278_s25, 4294965248  ;;  %p12_p3 = scmp.ge.s32.totalorder %s2027_s15, 4   ;;  %s2450_s9 = smov %s1972_s10 }
 0x1d4   : > { %s2451_s10 = smov %s1976_s11  ;;  %s2452_s11 = smov %s2038_s18 }
 0x1d5   : > { %s2453_s12 = smov %s2027_s15  ;;  %14 = sbr.rel (!%p12_p3) target bundleno = 3 (0x3), region = 63 }
 0x1dc   :  { %1283 = vsyncpa [#allocation3], 1 }
 0x1dd   :  { %1285 = vsyncpa [#allocation3 + $0x1], 1 }

</bundles_post_ra>
